<compile_context>
chip_gen: v7x
topology: tpu7x:2x2x1
jax: 0.10.0
libtpu: 0.0.40
codegen_flags: <defaults>
</compile_context>

<pallas_src>
import jax
import jax.numpy as jnp
from jax.experimental import pallas as pl
from jax.experimental.pallas import tpu as pltpu


def _round_up(x, m):
    return ((x + m - 1) // m) * m


def _matmul_bias_kernel_single_k(x_ref, w_ref, b_ref, o_ref):
    # x_ref: (tm, K)  w_ref: (K, tn)  b_ref: (1, tn)  o_ref: (tm, tn)
    acc = jnp.dot(x_ref[...], w_ref[...], preferred_element_type=jnp.float32)
    o_ref[...] = (acc + b_ref[...].astype(jnp.float32)).astype(o_ref.dtype)


def _matmul_bias_kernel_multi_k(x_ref, w_ref, b_ref, o_ref, acc_ref):
    # x_ref: (tm, tk)  w_ref: (tk, tn)  b_ref: (1, tn)  o_ref: (tm, tn)
    k = pl.program_id(2)

    @pl.when(k == 0)
    def _():
        acc_ref[...] = jnp.zeros_like(acc_ref)

    acc_ref[...] += jnp.dot(x_ref[...], w_ref[...],
                            preferred_element_type=jnp.float32)

    @pl.when(k == pl.num_programs(2) - 1)
    def _():
        o_ref[...] = (acc_ref[...] + b_ref[...].astype(jnp.float32)
                      ).astype(o_ref.dtype)


def prepare_weight(weight, mm_hidden_size):
    """One-time weight re-layout (do this at init / load time, not per call).

    PyTorch applies the linear to the permuted features
        flat[k*4 + t] = x[b, g, t, k]   (k = channel, t = token-in-group).
    We feed the kernel the plain token-major reshape flat2[t*c + k] instead,
    so the weight columns are permuted once to match:
        w2[n, t*c + k] = weight[n, k*4 + t].
    Returned transposed to (K, N) so the kernel computes a plain x @ w.
    """
    weight = jnp.asarray(weight)
    n, k4 = weight.shape
    c = mm_hidden_size
    assert k4 == 4 * c
    w2 = weight.reshape(n, c, 4).transpose(0, 2, 1).reshape(n, 4 * c)
    return w2.T  # (K, N)


def vanilla_forward(x, w_kn, bias, *, compute_dtype=jnp.bfloat16,
                    tm=256, tn=256, tk=512,
                    vmem_limit_bytes=64 * 1024 * 1024):
    """x: (b, T, c); w_kn: (4*c, N) from prepare_weight(); bias: (N,)."""
    b, num_tokens, c = x.shape
    if num_tokens % 4 != 0:
        raise ValueError("num_tokens must be divisible by 4")
    g = num_tokens // 4

    M, K = b * g, 4 * c
    kk, N = w_kn.shape
    assert kk == K

    # Token-major reshape only (essentially free); the permute lives in w_kn.
    x2d = x.reshape(M, K)

    # Clamp tiles to the (aligned) problem size; keep (8, 128) alignment so
    # the output stores stay lane-dense (unmasked vst).
    tm = min(tm, _round_up(M, 8))
    tn = min(tn, _round_up(N, 128))
    tk = min(tk, _round_up(K, 128))
    Mp, Np, Kp = _round_up(M, tm), _round_up(N, tn), _round_up(K, tk)

    if (Mp, Kp) != (M, K):
        x2d = jnp.pad(x2d, ((0, Mp - M), (0, Kp - K)))
    w2d = w_kn
    if (Kp, Np) != (K, N):
        w2d = jnp.pad(w2d, ((0, Kp - K), (0, Np - N)))
    b1d = bias
    if Np != N:
        b1d = jnp.pad(b1d, (0, Np - N))

    xp = x2d.astype(compute_dtype)
    wp = w2d.astype(compute_dtype)
    bp = b1d.reshape(1, Np).astype(jnp.float32)

    n_k = Kp // tk
    itemsize = jnp.dtype(compute_dtype).itemsize
    cost = pl.CostEstimate(
        flops=2 * Mp * Np * Kp,
        transcendentals=0,
        bytes_accessed=(Mp * Kp + Kp * Np) * itemsize + Np * 4 + Mp * Np * 4,
    )

    if n_k == 1:
        # Fast path: single K block -> no scratch accumulator, no reduction
        # axis, every grid dim parallel.
        out2d = pl.pallas_call(
            _matmul_bias_kernel_single_k,
            out_shape=jax.ShapeDtypeStruct((Mp, Np), x.dtype),
            grid_spec=pltpu.PrefetchScalarGridSpec(
                num_scalar_prefetch=0,
                grid=(Mp // tm, Np // tn),
                in_specs=[
                    pl.BlockSpec((tm, Kp), lambda i, j: (i, 0)),
                    pl.BlockSpec((Kp, tn), lambda i, j: (0, j)),
                    pl.BlockSpec((1, tn), lambda i, j: (0, j)),
                ],
                out_specs=pl.BlockSpec((tm, tn), lambda i, j: (i, j)),
            ),
            compiler_params=pltpu.CompilerParams(
                dimension_semantics=("parallel", "parallel"),
                vmem_limit_bytes=vmem_limit_bytes,
            ),
            cost_estimate=cost,
        )(xp, wp, bp)
    else:
        out2d = pl.pallas_call(
            _matmul_bias_kernel_multi_k,
            out_shape=jax.ShapeDtypeStruct((Mp, Np), x.dtype),
            grid_spec=pltpu.PrefetchScalarGridSpec(
                num_scalar_prefetch=0,
                grid=(Mp // tm, Np // tn, n_k),
                in_specs=[
                    pl.BlockSpec((tm, tk), lambda i, j, k: (i, k)),
                    pl.BlockSpec((tk, tn), lambda i, j, k: (k, j)),
                    pl.BlockSpec((1, tn), lambda i, j, k: (0, j)),
                ],
                out_specs=pl.BlockSpec((tm, tn), lambda i, j, k: (i, j)),
                scratch_shapes=[pltpu.VMEM((tm, tn), jnp.float32)],
            ),
            compiler_params=pltpu.CompilerParams(
                dimension_semantics=("parallel", "parallel", "arbitrary"),
                vmem_limit_bytes=vmem_limit_bytes,
            ),
            cost_estimate=cost,
        )(xp, wp, bp)

    return out2d[:M, :N].reshape(b, g, N)


if __name__ == "__main__":
    # Small shapes consistent with the module:
    #   mm_hidden_size c = 32, hidden_size = 64, batch = 2, tokens = 8
    B, T, C = 2, 8, 32
    OUC = 64
    K = 4 * C

    key = jax.random.PRNGKey(0)
    kx, kw, kb = jax.random.split(key, 3)

    x = jax.random.normal(kx, (B, T, C), dtype=jnp.float32)
    # Deterministic Linear-like init: U(-1/sqrt(fan_in), 1/sqrt(fan_in))
    bound = 1.0 / (K ** 0.5)
    weight = jax.random.uniform(kw, (OUC, K), minval=-bound, maxval=bound,
                                dtype=jnp.float32)
    bias = jax.random.uniform(kb, (OUC,), minval=-bound, maxval=bound,
                              dtype=jnp.float32)

    # One-time weight re-layout (init-time cost, not per forward call).
    w_kn = prepare_weight(weight, C)

    out = vanilla_forward(x, w_kn, bias)
    out = jax.block_until_ready(out)

    # Pure-JAX reference with exact PyTorch semantics (float32).
    ref_f32 = (x.reshape(B, T // 4, 4, C).transpose(0, 1, 3, 2)
                 .reshape(B, T // 4, K) @ weight.T) + bias
    # Reference with the same bf16-in / f32-accumulate numerics as the kernel.
    ref_bf16 = (jnp.dot(x.reshape(B * (T // 4), K).astype(jnp.bfloat16),
                        w_kn.astype(jnp.bfloat16),
                        preferred_element_type=jnp.float32)
                + bias).reshape(B, T // 4, OUC)

    assert out.shape == (B, T // 4, OUC)
    assert jnp.allclose(out, ref_bf16, atol=2e-3, rtol=2e-3)
    assert jnp.allclose(out, ref_f32, atol=5e-2, rtol=5e-2)

    print("KERNEL_OK")
</pallas_src>

<mosaic_0001>
module attributes {stable_mosaic.version = 11 : i64} {
  func.func @_matmul_bias_kernel_single_k(%arg0: i32, %arg1: i32, %arg2: memref<8x128xbf16, #tpu.memory_space<vmem>>, %arg3: memref<128x128xbf16, #tpu.memory_space<vmem>>, %arg4: memref<1x128xf32, #tpu.memory_space<vmem>>, %arg5: memref<8x128xf32, #tpu.memory_space<vmem>>) attributes {dimension_semantics = [#tpu.dimension_semantics<parallel>, #tpu.dimension_semantics<parallel>], iteration_bounds = array<i64: 1, 1>, scalar_prefetch = 0 : i64, scratch_operands = 0 : i64, tpu.core_type = #tpu.core_type<tc>, window_params = [{transform_indices = @transform_0, window_bounds = array<i64: 8, 128>}, {transform_indices = @transform_1, window_bounds = array<i64: 128, 128>}, {transform_indices = @transform_2, window_bounds = array<i64: 1, 128>}, {transform_indices = @transform_3, window_bounds = array<i64: 8, 128>}]} {
    %c0 = arith.constant 0 : index
    %c0_0 = arith.constant 0 : index
    %0 = vector.load %arg2[%c0, %c0_0] : memref<8x128xbf16, #tpu.memory_space<vmem>>, vector<8x128xbf16>
    %c0_1 = arith.constant 0 : index
    %c0_2 = arith.constant 0 : index
    %1 = vector.load %arg3[%c0_1, %c0_2] : memref<128x128xbf16, #tpu.memory_space<vmem>>, vector<128x128xbf16>
    %cst = arith.constant dense<0.000000e+00> : vector<8x128xf32>
    %2 = tpu.matmul %0, %1, %cst {dimension_numbers = #tpu.dot_dimension_numbers<[1], [0], [0], [1], [0, 0, 1, 1], [], []>} : vector<8x128xbf16>, vector<128x128xbf16>, vector<8x128xf32> -> vector<8x128xf32>
    %c0_3 = arith.constant 0 : index
    %c0_4 = arith.constant 0 : index
    %3 = vector.load %arg4[%c0_3, %c0_4] : memref<1x128xf32, #tpu.memory_space<vmem>>, vector<1x128xf32>
    %4 = vector.broadcast %3 : vector<1x128xf32> to vector<8x128xf32>
    %5 = arith.addf %2, %4 : vector<8x128xf32>
    %c0_5 = arith.constant 0 : index
    %c0_6 = arith.constant 0 : index
    %6 = vector.load %arg5[%c0_5, %c0_6] : memref<8x128xf32, #tpu.memory_space<vmem>>, vector<8x128xf32>
    tpu.vector_store %arg5[%c0_5, %c0_6], %5 {strides = array<i32>} : memref<8x128xf32, #tpu.memory_space<vmem>>, vector<8x128xf32>,
    return
  }
  func.func @transform_0(%arg0: i32, %arg1: i32) -> (i32, i32) {
    %c0_i32 = arith.constant 0 : i32
    %c0_i32_0 = arith.constant 0 : i32
    return %arg0, %c0_i32 : i32, i32
  }
  func.func @transform_1(%arg0: i32, %arg1: i32) -> (i32, i32) {
    %c0_i32 = arith.constant 0 : i32
    %c0_i32_0 = arith.constant 0 : i32
    return %c0_i32, %arg1 : i32, i32
  }
  func.func @transform_2(%arg0: i32, %arg1: i32) -> (i32, i32) {
    %c0_i32 = arith.constant 0 : i32
    %c0_i32_0 = arith.constant 0 : i32
    return %c0_i32, %arg1 : i32, i32
  }
  func.func @transform_3(%arg0: i32, %arg1: i32) -> (i32, i32) {
    %c0_i32 = arith.constant 0 : i32
    return %arg0, %arg1 : i32, i32
  }
}

</mosaic_0001>

<bundles_post_ra>
// kernel: tpu_custom_call.1
= control target key start
LH: loop header
LB: loop body
LE: loop exit
PB: predicated region body
PF: predicated region fallthrough
CT: control target
= control target key end

     0   :  { %8 = vsyncpa [#allocation3], 0  ;;  %s406_s0 = inlined_call_operand.hbm [shape: bf16[8,128], index: 0, kind: input, shape index: {}]   ;;  %s407_s1 = inlined_call_operand.hbm [shape: bf16[128,128], index: 1, kind: input, shape index: {}]   ;;  %s408_s2 = inlined_call_operand.hbm [shape: f32[1,128], index: 2, kind: input, shape index: {}]   ;;  %s409_s3 = inlined_call_operand.hbm [shape: f32[8,128], index: 3, kind: output, shape index: {}]  }
   0x1   :  { %9 = vsyncpa [#allocation6], 0 }
   0x2   :  { %10 = vsyncpa [#allocation4], 0  ;;  %s330_s12 = smov [#allocation5]   ;;  %s236_s16 = scalar_lea.hbm %s407_s1, 1024 }
   0x3   :  { %s26_s13 = sshll.u32 %s330_s12, 4  ;;  %p237_p0 = scmp.ne.s32.totalorder %s407_s1, %s236_s16  ;;  %s27_s13 = int_to_ptr.vmem [resolvable:$true] %s26_s13 }
   0x4   :  { %p240_p1 = scmp.lt.u32.totalorder %s236_s16, %s407_s1 }
   0x6   :  { %p242_p2 = pnand %p240_p1, %p237_p0 }
   0x8   :  { %245 = shalt.err (!%p242_p2)
}
   0x9   :  { %s246_s21 = scalar_lea.vmem %s27_s13, 1024  ;;  %p251_p4 = scmp.lt.s32.totalorder %s27_s13, %s27_s13 }
   0xa   :  { %p247_p3 = scmp.ne.s32.totalorder %s27_s13, %s246_s21  ;;  %p252_p5 = scmp.lt.s32.totalorder %s246_s21, %s246_s21 }
   0xc   :  { %p253_p6 = por %p252_p5, %p251_p4 }
   0xe   :  { %p254_p7 = pnand %p253_p6, %p247_p3 }
  0x10   :  { %257 = shalt.err (!%p254_p7)
}
  0x11   :  { %s331_s22 = smov 64   ;;  %s332_s23 = smov 4  }
  0x12   :  { %32 = dma.hbm_to_vmem [thread:$0]  %s407_s1, 1024, %s27_s13, [#allocation6], %s331_s22, %s331_s22, %s332_s23  }
  0x13   :  { %s333_s26 = smov [#allocation2]   ;;  %s334_s28 = smov [#allocation7]  }
  0x14   :  { %s17_s27 = sshll.u32 %s333_s26, 4  ;;  %s39_s29 = sshll.u32 %s334_s28, 4  ;;  %s18_s27 = int_to_ptr.vmem [resolvable:$true] %s17_s27  ;;  %s40_s29 = int_to_ptr.vmem [resolvable:$true] %s39_s29 }
  0x15   :  { %s258_s5 = scalar_lea.hbm %s406_s0, 64 }
  0x16   :  { %p259_p8 = scmp.ne.s32.totalorder %s406_s0, %s258_s5  ;;  %p262_p9 = scmp.lt.u32.totalorder %s258_s5, %s406_s0 }
  0x18   :  { %p264_p10 = pnand %p262_p9, %p259_p8 }
  0x1a   :  { %267 = shalt.err (!%p264_p10)
}
  0x1b   :  { %s268_s1 = scalar_lea.vmem %s18_s27, 64  ;;  %p273_p12 = scmp.lt.s32.totalorder %s18_s27, %s18_s27 }
  0x1c   :  { %p269_p11 = scmp.ne.s32.totalorder %s18_s27, %s268_s1  ;;  %p274_p13 = scmp.lt.s32.totalorder %s268_s1, %s268_s1 }
  0x1e   :  { %p275_p0 = por %p274_p13, %p273_p12 }
  0x20   :  { %p276_p1 = pnand %p275_p0, %p269_p11 }
  0x22   :  { %279 = shalt.err (!%p276_p1)
}
  0x23   :  { %20 = dma.hbm_to_vmem [thread:$0]  %s406_s0, 64, %s18_s27, [#allocation3]  }
  0x24   :  { %s280_s14 = scalar_lea.hbm %s408_s2, 16 }
  0x25   :  { %p281_p2 = scmp.ne.s32.totalorder %s408_s2, %s280_s14  ;;  %p284_p3 = scmp.lt.u32.totalorder %s280_s14, %s408_s2 }
  0x27   :  { %p286_p4 = pnand %p284_p3, %p281_p2 }
  0x29   :  { %289 = shalt.err (!%p286_p4)
}
  0x2a   :  { %s290_s19 = scalar_lea.vmem %s40_s29, 16  ;;  %s294_s20 = scalar_lea.vmem %s40_s29, 32 }
  0x2b   :  { %p291_p5 = scmp.ne.s32.totalorder %s40_s29, %s290_s19  ;;  %p295_p6 = scmp.lt.s32.totalorder %s40_s29, %s40_s29 }
  0x2c   :  { %p296_p7 = scmp.lt.s32.totalorder %s294_s20, %s290_s19 }
  0x2e   :  { %p297_p8 = por %p296_p7, %p295_p6 }
  0x30   :  { %p298_p9 = pnand %p297_p8, %p291_p5 }
  0x32   :  { %301 = shalt.err (!%p298_p9)
}
  0x33   :  { %42 = dma.hbm_to_vmem [thread:$0]  %s408_s2, 16, %s40_s29, [#allocation6]  }
  0x34   :  { %324 = dma.done.wait [#allocation3], 64  }
  0x35   :  { %325 = vsyncadd [#allocation3], 4294967232 }
  0x36   :  { %326 = dma.done.wait [#allocation6], 1040  }
  0x37   :  { %327 = vsyncadd [#allocation6], 4294966256  ;;  %v335_v0 = vmov 0.0   ;;  %vm336_vm0 = vmmov 0   ;;  %v228_v1 = vld [vmem:[#allocation5] sm:$0xff]   ;;  %v229_v2 = vld [vmem:[#allocation5 + $0x8] sm:$0xff]  }
  0x38   :  { %200 = vmatprep.subr.bf16.mxu0 %v335_v0  ;;  %216 = vmatprep.mubr.msk.bf16.mxu0 %vm336_vm0, %v335_v0  ;;  %v230_v3 = vld [vmem:[#allocation5 + $0x10] sm:$0xff]   ;;  %v231_v4 = vld [vmem:[#allocation5 + $0x18] sm:$0xff]   ;;  %v232_v5 = vld [vmem:[#allocation5 + $0x20] sm:$0xff]   ;;  %s337_s2 = smov [#allocation8]  }
  0x39   :  { %201 = vmatpush3.bf16.msra.mxu0 %v228_v1  ;;  %v233_v6 = vld [vmem:[#allocation5 + $0x28] sm:$0xff]   ;;  %v234_v7 = vld [vmem:[#allocation5 + $0x30] sm:$0xff]   ;;  %v235_v8 = vld [vmem:[#allocation5 + $0x38] sm:$0xff]   ;;  %s172_s22 = sshll.u32 %s337_s2, 4  ;;  %s173_s22 = int_to_ptr.vmem [resolvable:$true] %s172_s22 }
  0x3a   :  { %202 = vmatprep.subr.bf16.mxu0 %v335_v0  ;;  %v53_v9 = vld [vmem:[#allocation2] sm:$0xf]  ;;  %v182_v10 = vld [vmem:[#allocation7] ss:$0 sm:$0xff]  ;;  %s302_s23 = scalar_lea.vmem %s173_s22, 128  ;;  %p307_p11 = scmp.lt.s32.totalorder %s173_s22, %s173_s22 }
  0x3b   :  { %p303_p10 = scmp.ne.s32.totalorder %s173_s22, %s302_s23  ;;  %p308_p12 = scmp.lt.s32.totalorder %s302_s23, %s302_s23 }
  0x3d   :  { %203 = vmatpush3.bf16.msra.mxu0 %v229_v2  ;;  %p309_p13 = por %p308_p12, %p307_p11 }
  0x3e   :  { %204 = vmatprep.subr.bf16.mxu0 %v335_v0 }
  0x3f   :  { %p310_p0 = pnand %p309_p13, %p303_p10 }
  0x41   :  { %205 = vmatpush3.bf16.msra.mxu0 %v230_v3 }
  0x42   :  { %206 = vmatprep.subr.bf16.mxu0 %v335_v0 }
  0x45   :  { %207 = vmatpush3.bf16.msra.mxu0 %v231_v4 }
  0x46   :  { %208 = vmatprep.subr.bf16.mxu0 %v335_v0 }
  0x49   :  { %209 = vmatpush3.bf16.msra.mxu0 %v232_v5 }
  0x4a   :  { %210 = vmatprep.subr.bf16.mxu0 %v335_v0 }
  0x4d   :  { %211 = vmatpush3.bf16.msra.mxu0 %v233_v6 }
  0x4e   :  { %212 = vmatprep.subr.bf16.mxu0 %v335_v0 }
  0x51   :  { %213 = vmatpush3.bf16.msra.mxu0 %v234_v7 }
  0x52   :  { %214 = vmatprep.subr.bf16.mxu0 %v335_v0 }
  0x55   :  { %215 = vmatpush3.bf16.msra.mxu0 %v235_v8 }
  0x58   :  { %217 = vmatmul.mubr.bf16.vlgmr.msra.gmra.mrb[0].mxu0 %v53_v9 }
 0x12b   :  { %v159_v11 = vpop.f32.mrb[0].mxu0 }
 0x12c   :  { %v160_v12 = vadd.f32 %v182_v10, %v159_v11  ;;  %v218_v13 = vpop.f32.mrb[1].mxu0 }
 0x12d   :  { %v162_v14 = vpop.f32.mrb[2].mxu0 }
 0x12e   :  { %165 = vst [vmem:[#allocation8] sm:$0xff] %v160_v12  ;;  %v219_v15 = vpop.f32.mrb[3].mxu0 }
 0x12f   :  { %313 = shalt.err (!%p310_p0)
}
 0x130   :  { %s314_s26 = scalar_lea.hbm %s409_s3, 128 }
 0x131   :  { %p315_p1 = scmp.ne.s32.totalorder %s409_s3, %s314_s26  ;;  %p318_p2 = scmp.lt.u32.totalorder %s314_s26, %s409_s3 }
 0x133   :  { %p320_p3 = pnand %p318_p2, %p315_p1 }
 0x135   :  { %323 = shalt.err (!%p320_p3)
}
 0x136   :  { %175 = dma.vmem_to_hbm [thread:$0]  %s173_s22, 128, %s409_s3, [#allocation4]  }
 0x137   :  { %328 = dma.done.wait [#allocation4], 128  }
 0x138   :  { %329 = vsyncadd [#allocation4], 4294967168 }
 0x139   :  { %179 = vsyncpa [#allocation3], 1 }
 0x13a   :  { %180 = vsyncpa [#allocation6], 1 }
 0x13b   :  { %181 = vsyncpa [#allocation4], 1 }

</bundles_post_ra>
